<compile_context>
chip_gen: v7x
topology: tpu7x:2x2x1
jax: 0.10.0
libtpu: 0.0.40
codegen_flags: <defaults>
</compile_context>

<pallas_src>
import functools

import jax
import jax.numpy as jnp
from jax.experimental import pallas as pl
from jax.experimental.pallas import tpu as pltpu


def _rnn_kernel(x_ref,       # (T, Bt, D)  time-major input tile (f32)
                w1_ref,      # (D, 32)     fc1 weight (pre-transposed; f32 or bf16)
                b1_ref,      # (1, 32)     fc1 bias (f32)
                wi_ref,      # (32, 48)    [W_ir | W_iz | W_in]  (f32 or bf16)
                bi_ref,      # (1, 48)     [b_r  | b_z  | b_in]  (f32)
                wh_ref,      # (16, 48)    [W_hr | W_hz | W_hn]  (f32)
                bhn_ref,     # (1, 16)     b_hn (kept separate: r * (gh_n + b_hn))
                w2_ref,      # (16, 128)   fc2 weight zero-padded to 128 lanes (f32)
                b2_ref,      # (1, 128)    fc2 bias zero-padded (f32)
                out_ref):    # (Bt, 128)   lane-dense output slab
    T, Bt, D = x_ref.shape
    H = wh_ref.shape[0]          # 16

    # ---- load weights once (no per-iteration vld / broadcast re-emission) ----
    w1 = w1_ref[...]
    wi = wi_ref[...]
    wh = wh_ref[...]                                       # (16, 48)
    bhn_b = jnp.broadcast_to(bhn_ref[...], (Bt, H))        # hoisted: broadcast once, not T times
    mm_dtype = w1.dtype                                    # f32 or bf16 matmul operands

    # ---- fc1 for all timesteps at once (single well-shaped MXU matmul) ----
    # (T, Bt, D) -> (T*Bt, D): Bt % 8 == 0 so this collapse is layout-identical (no relayout).
    x2 = x_ref[...].reshape(T * Bt, D).astype(mm_dtype)
    h1 = jnp.tanh(
        jnp.dot(x2, w1, preferred_element_type=jnp.float32) + b1_ref[...]
    )                                                      # (T*Bt, 32), f32

    # ---- input-side gate projections for ALL timesteps, input-gate biases folded in ----
    gi_all = (
        jnp.dot(h1.astype(mm_dtype), wi, preferred_element_type=jnp.float32)
        + bi_ref[...]
    )                                                      # (T*Bt, 48), f32

    # ---- GRU recurrence (PyTorch gate order r, z, n; h0 = 0) ----
    h = jnp.zeros((Bt, H), dtype=jnp.float32)
    for t in range(T):  # T is small & static: fully unrolled
        gi = gi_all[t * Bt:(t + 1) * Bt, :]                # contiguous sublane slice
        gh = jnp.dot(h, wh, preferred_element_type=jnp.float32)   # (Bt, 48): 1 MXU push/step
        # merged r/z: one add + one EUP sigmoid over 32 adjacent lanes
        rz = jax.nn.sigmoid(gi[:, :2 * H] + gh[:, :2 * H])
        r = rz[:, :H]
        z = rz[:, H:2 * H]
        n = jnp.tanh(gi[:, 2 * H:3 * H] + r * (gh[:, 2 * H:3 * H] + bhn_b))
        h = n + z * (h - n)                                # == (1-z)*n + z*h, one fewer VPU op

    # ---- fc2 into a lane-dense (Bt, 128) slab (wrapper slices to (B, 2)) ----
    out_ref[...] = (
        jnp.dot(h, w2_ref[...], preferred_element_type=jnp.float32) + b2_ref[...]
    )


def pack_params(params, n_out_pad=128, use_bf16_matmuls=False):
    """One-time packing of PyTorch-style parameters into the kernel layout."""
    mm_dtype = jnp.bfloat16 if use_bf16_matmuls else jnp.float32
    h = params["whr"].shape[0]
    n_out = params["w2"].shape[1]
    w2_pad = jnp.zeros((h, n_out_pad), jnp.float32).at[:, :n_out].set(params["w2"])
    b2_pad = jnp.zeros((1, n_out_pad), jnp.float32).at[:, :n_out].set(params["b2"])
    return {
        "w1": params["w1"].astype(mm_dtype),
        "b1": params["b1"],
        "wi_cat": jnp.concatenate(
            [params["wir"], params["wiz"], params["win"]], axis=1).astype(mm_dtype),
        "bi_cat": jnp.concatenate([params["br"], params["bz"], params["bin"]], axis=1),
        "wh_cat": jnp.concatenate([params["whr"], params["whz"], params["whn"]], axis=1),
        "bhn": params["bhn"],
        "w2_pad": w2_pad,
        "b2_pad": b2_pad,
        "n_out": n_out,
    }


def _full_spec(a):
    nd = a.ndim
    return pl.BlockSpec(a.shape, lambda i, _nd=nd: (0,) * _nd)


@functools.partial(jax.jit, static_argnames=("n_out", "b_tile"))
def _forward_impl(seqs, packed, n_out, b_tile):
    B, T, D = seqs.shape
    B_pad = max(8, ((B + 7) // 8) * 8)           # pad batch to the f32 sublane multiple

    # Time-major (T, B_pad, D): transpose + pad-into-zeros fused into one update (fewer XLA ops).
    x_tm = jnp.transpose(seqs.astype(jnp.float32), (1, 0, 2))
    if B_pad != B:
        x_tm = jax.lax.dynamic_update_slice(
            jnp.zeros((T, B_pad, D), jnp.float32), x_tm, (0, 0, 0))

    args = (
        x_tm,
        packed["w1"], packed["b1"],
        packed["wi_cat"], packed["bi_cat"],
        packed["wh_cat"], packed["bhn"],
        packed["w2_pad"], packed["b2_pad"],
    )
    n_out_pad = packed["w2_pad"].shape[1]

    use_grid = (b_tile is not None and b_tile % 8 == 0
                and B_pad % b_tile == 0 and B_pad // b_tile >= 2)

    if not use_grid:
        # Single-shot path: no grid, whole arrays resident in VMEM, no double-buffering.
        out_pad = pl.pallas_call(
            _rnn_kernel,
            out_shape=jax.ShapeDtypeStruct((B_pad, n_out_pad), jnp.float32),
            in_specs=[pl.BlockSpec(memory_space=pltpu.MemorySpace.VMEM) for _ in args],
            out_specs=pl.BlockSpec(memory_space=pltpu.MemorySpace.VMEM),
        )(*args)
    else:
        # Batch-parallel path: independent GRU recurrences per batch tile; on v7x the
        # "parallel" axis is sharded across the two TensorCores.
        n_tiles = B_pad // b_tile
        in_specs = [pl.BlockSpec((T, b_tile, D), lambda i: (0, i, 0))]
        in_specs += [_full_spec(a) for a in args[1:]]
        out_specs = pl.BlockSpec((b_tile, n_out_pad), lambda i: (i, 0))
        out_pad = pl.pallas_call(
            _rnn_kernel,
            out_shape=jax.ShapeDtypeStruct((B_pad, n_out_pad), jnp.float32),
            grid=(n_tiles,),
            in_specs=in_specs,
            out_specs=out_specs,
            compiler_params=pltpu.CompilerParams(
                dimension_semantics=("parallel",)),
        )(*args)

    return out_pad[:B, :n_out]


def my_variable_rnn_forward(seqs, lengths, packed, b_tile=128):
    """Pallas implementation of MyVariableRNN.forward((seqs, lengths))."""
    del lengths  # unused by the reference forward (no packing actually happens)
    return _forward_impl(seqs,
                         {k: v for k, v in packed.items() if k != "n_out"},
                         packed["n_out"], b_tile)


def init_params(key, dim_input, h1=32, h=16, n_out=2):
    """Deterministic synthetic parameters (shapes match the PyTorch module)."""
    ks = jax.random.split(key, 12)
    s = 0.1
    return {
        # fc1: Linear(dim_input, 32) -> stored transposed (D, 32)
        "w1": s * jax.random.normal(ks[0], (dim_input, h1), jnp.float32),
        "b1": s * jax.random.normal(ks[1], (1, h1), jnp.float32),
        # GRU weight_ih_l0 (3H, 32) split per gate and transposed -> (32, 16)
        "wir": s * jax.random.normal(ks[2], (h1, h), jnp.float32),
        "wiz": s * jax.random.normal(ks[3], (h1, h), jnp.float32),
        "win": s * jax.random.normal(ks[4], (h1, h), jnp.float32),
        # GRU weight_hh_l0 (3H, 16) split per gate and transposed -> (16, 16)
        "whr": s * jax.random.normal(ks[5], (h, h), jnp.float32),
        "whz": s * jax.random.normal(ks[6], (h, h), jnp.float32),
        "whn": s * jax.random.normal(ks[7], (h, h), jnp.float32),
        # biases: b_ir+b_hr and b_iz+b_hz merged (exact); b_in / b_hn stay separate.
        "br": s * jax.random.normal(ks[8], (1, h), jnp.float32),
        "bz": s * jax.random.normal(ks[9], (1, h), jnp.float32),
        "bin": s * jax.random.normal(ks[10], (1, h), jnp.float32),
        "bhn": s * jax.random.normal(ks[11], (1, h), jnp.float32),
        # fc2: Linear(16, 2) -> stored transposed (16, 2)
        "w2": s * jax.random.normal(jax.random.fold_in(key, 100), (h, n_out), jnp.float32),
        "b2": s * jax.random.normal(jax.random.fold_in(key, 101), (1, n_out), jnp.float32),
    }


def reference_forward(seqs, params, matmul_dtype=jnp.float32):
    """Pure-JAX reference of the same math (mirrors the optional bf16 matmul operands)."""
    B, T, _ = seqs.shape
    f32 = jnp.float32
    w1 = params["w1"].astype(matmul_dtype)
    h1 = jnp.tanh(
        jnp.einsum("btd,dh->bth", seqs.astype(matmul_dtype), w1,
                   preferred_element_type=f32) + params["b1"])
    h = jnp.zeros((B, params["whr"].shape[0]), f32)

    def idot(a, w):
        return jnp.dot(a.astype(matmul_dtype), w.astype(matmul_dtype),
                       preferred_element_type=f32)

    for t in range(T):
        x_t = h1[:, t, :]
        r = jax.nn.sigmoid(idot(x_t, params["wir"])
                           + jnp.dot(h, params["whr"], preferred_element_type=f32)
                           + params["br"])
        z = jax.nn.sigmoid(idot(x_t, params["wiz"])
                           + jnp.dot(h, params["whz"], preferred_element_type=f32)
                           + params["bz"])
        n = jnp.tanh(idot(x_t, params["win"]) + params["bin"]
                     + r * (jnp.dot(h, params["whn"], preferred_element_type=f32)
                            + params["bhn"]))
        h = (1.0 - z) * n + z * h
    return jnp.dot(h, params["w2"], preferred_element_type=f32) + params["b2"]


if __name__ == "__main__":
    key = jax.random.PRNGKey(0)
    B, T, dim_input = 2, 8, 32

    k_seq, k_par = jax.random.split(key)
    seqs = jax.random.normal(k_seq, (B, T, dim_input), jnp.float32)
    lengths = jnp.full((B,), T, jnp.int32)  # unused by forward (interface parity)
    params = init_params(k_par, dim_input)

    # --- 1) single-shot (gridless) f32 path, B=2 ---
    packed = pack_params(params)
    out = jax.block_until_ready(my_variable_rnn_forward(seqs, lengths, packed))
    ref = reference_forward(seqs, params)
    assert out.shape == (B, 2)
    assert jnp.allclose(out, ref, rtol=1e-4, atol=1e-4), (out, ref)

    # --- 2) batch-parallel grid path (v7x 2-TC scaling), B=32 with b_tile=16 ---
    B2 = 32
    seqs2 = jax.random.normal(jax.random.fold_in(key, 7), (B2, T, dim_input), jnp.float32)
    lengths2 = jnp.full((B2,), T, jnp.int32)
    out2 = jax.block_until_ready(my_variable_rnn_forward(seqs2, lengths2, packed, b_tile=16))
    ref2 = reference_forward(seqs2, params)
    assert out2.shape == (B2, 2)
    assert jnp.allclose(out2, ref2, rtol=1e-4, atol=1e-4), (out2, ref2)

    # --- 3) bf16 operands on the hoisted (T*B-scaling) matmuls; recurrence stays f32 ---
    packed_bf16 = pack_params(params, use_bf16_matmuls=True)
    out3 = jax.block_until_ready(my_variable_rnn_forward(seqs, lengths, packed_bf16))
    ref3 = reference_forward(seqs, params, matmul_dtype=jnp.bfloat16)
    assert jnp.allclose(out3, ref3, rtol=1e-3, atol=1e-3), (out3, ref3)

    print("KERNEL_OK")
</pallas_src>

<mosaic_0001>
module attributes {stable_mosaic.version = 11 : i64} {
  func.func @_rnn_kernel(%arg0: memref<8x8x32xf32, #tpu.memory_space<vmem>>, %arg1: memref<32x32xf32, #tpu.memory_space<vmem>>, %arg2: memref<1x32xf32, #tpu.memory_space<vmem>>, %arg3: memref<32x48xf32, #tpu.memory_space<vmem>>, %arg4: memref<1x48xf32, #tpu.memory_space<vmem>>, %arg5: memref<16x48xf32, #tpu.memory_space<vmem>>, %arg6: memref<1x16xf32, #tpu.memory_space<vmem>>, %arg7: memref<16x128xf32, #tpu.memory_space<vmem>>, %arg8: memref<1x128xf32, #tpu.memory_space<vmem>>, %arg9: memref<8x128xf32, #tpu.memory_space<vmem>>) attributes {dimension_semantics = [], scalar_prefetch = 0 : i64, scratch_operands = 0 : i64, tpu.core_type = #tpu.core_type<tc>} {
    %c0 = arith.constant 0 : index
    %c0_0 = arith.constant 0 : index
    %0 = vector.load %arg1[%c0, %c0_0] : memref<32x32xf32, #tpu.memory_space<vmem>>, vector<32x32xf32>
    %c0_1 = arith.constant 0 : index
    %c0_2 = arith.constant 0 : index
    %1 = vector.load %arg3[%c0_1, %c0_2] : memref<32x48xf32, #tpu.memory_space<vmem>>, vector<32x48xf32>
    %c0_3 = arith.constant 0 : index
    %c0_4 = arith.constant 0 : index
    %2 = vector.load %arg5[%c0_3, %c0_4] : memref<16x48xf32, #tpu.memory_space<vmem>>, vector<16x48xf32>
    %c0_5 = arith.constant 0 : index
    %c0_6 = arith.constant 0 : index
    %3 = vector.load %arg6[%c0_5, %c0_6] : memref<1x16xf32, #tpu.memory_space<vmem>>, vector<1x16xf32>
    %4 = vector.shape_cast %3 : vector<1x16xf32> to vector<1x16xf32>
    %5 = vector.broadcast %4 : vector<1x16xf32> to vector<8x16xf32>
    %c0_7 = arith.constant 0 : index
    %c0_8 = arith.constant 0 : index
    %c0_9 = arith.constant 0 : index
    %6 = vector.load %arg0[%c0_7, %c0_8, %c0_9] : memref<8x8x32xf32, #tpu.memory_space<vmem>>, vector<8x8x32xf32>
    %7 = vector.shape_cast %6 : vector<8x8x32xf32> to vector<64x32xf32>
    %cst = arith.constant dense<0.000000e+00> : vector<64x32xf32>
    %8 = tpu.matmul %7, %0, %cst {dimension_numbers = #tpu.dot_dimension_numbers<[1], [0], [0], [1], [0, 0, 1, 1], [], []>} : vector<64x32xf32>, vector<32x32xf32>, vector<64x32xf32> -> vector<64x32xf32>
    %c0_10 = arith.constant 0 : index
    %c0_11 = arith.constant 0 : index
    %9 = vector.load %arg2[%c0_10, %c0_11] : memref<1x32xf32, #tpu.memory_space<vmem>>, vector<1x32xf32>
    %10 = vector.broadcast %9 : vector<1x32xf32> to vector<64x32xf32>
    %11 = arith.addf %8, %10 : vector<64x32xf32>
    %12 = math.tanh %11 : vector<64x32xf32>
    %cst_12 = arith.constant dense<0.000000e+00> : vector<64x48xf32>
    %13 = tpu.matmul %12, %1, %cst_12 {dimension_numbers = #tpu.dot_dimension_numbers<[1], [0], [0], [1], [0, 0, 1, 1], [], []>} : vector<64x32xf32>, vector<32x48xf32>, vector<64x48xf32> -> vector<64x48xf32>
    %c0_13 = arith.constant 0 : index
    %c0_14 = arith.constant 0 : index
    %14 = vector.load %arg4[%c0_13, %c0_14] : memref<1x48xf32, #tpu.memory_space<vmem>>, vector<1x48xf32>
    %15 = vector.broadcast %14 : vector<1x48xf32> to vector<64x48xf32>
    %16 = arith.addf %13, %15 : vector<64x48xf32>
    %cst_15 = arith.constant 0.000000e+00 : f32
    %17 = vector.broadcast %cst_15 : f32 to vector<8x16xf32>
    %18 = vector.extract_strided_slice %16 {offsets = [0, 0], sizes = [8, 48], strides = [1, 1]} : vector<64x48xf32> to vector<8x48xf32>
    %cst_16 = arith.constant dense<0.000000e+00> : vector<8x48xf32>
    %19 = tpu.matmul %17, %2, %cst_16 {dimension_numbers = #tpu.dot_dimension_numbers<[1], [0], [0], [1], [0, 0, 1, 1], [], []>} : vector<8x16xf32>, vector<16x48xf32>, vector<8x48xf32> -> vector<8x48xf32>
    %20 = vector.extract_strided_slice %18 {offsets = [0, 0], sizes = [8, 32], strides = [1, 1]} : vector<8x48xf32> to vector<8x32xf32>
    %21 = vector.extract_strided_slice %19 {offsets = [0, 0], sizes = [8, 32], strides = [1, 1]} : vector<8x48xf32> to vector<8x32xf32>
    %22 = arith.addf %20, %21 : vector<8x32xf32>
    %23 = arith.negf %22 : vector<8x32xf32>
    %24 = math.exp %23 : vector<8x32xf32>
    %cst_17 = arith.constant 1.000000e+00 : f32
    %25 = vector.broadcast %cst_17 : f32 to vector<8x32xf32>
    %26 = arith.addf %25, %24 : vector<8x32xf32>
    %27 = arith.divf %25, %26 : vector<8x32xf32>
    %28 = vector.extract_strided_slice %27 {offsets = [0, 0], sizes = [8, 16], strides = [1, 1]} : vector<8x32xf32> to vector<8x16xf32>
    %29 = vector.extract_strided_slice %27 {offsets = [0, 16], sizes = [8, 16], strides = [1, 1]} : vector<8x32xf32> to vector<8x16xf32>
    %30 = vector.extract_strided_slice %18 {offsets = [0, 32], sizes = [8, 16], strides = [1, 1]} : vector<8x48xf32> to vector<8x16xf32>
    %31 = vector.extract_strided_slice %19 {offsets = [0, 32], sizes = [8, 16], strides = [1, 1]} : vector<8x48xf32> to vector<8x16xf32>
    %32 = arith.addf %31, %5 : vector<8x16xf32>
    %33 = arith.mulf %28, %32 : vector<8x16xf32>
    %34 = arith.addf %30, %33 : vector<8x16xf32>
    %35 = math.tanh %34 : vector<8x16xf32>
    %36 = arith.subf %17, %35 : vector<8x16xf32>
    %37 = arith.mulf %29, %36 : vector<8x16xf32>
    %38 = arith.addf %35, %37 : vector<8x16xf32>
    %39 = vector.extract_strided_slice %16 {offsets = [8, 0], sizes = [8, 48], strides = [1, 1]} : vector<64x48xf32> to vector<8x48xf32>
    %cst_18 = arith.constant dense<0.000000e+00> : vector<8x48xf32>
    %40 = tpu.matmul %38, %2, %cst_18 {dimension_numbers = #tpu.dot_dimension_numbers<[1], [0], [0], [1], [0, 0, 1, 1], [], []>} : vector<8x16xf32>, vector<16x48xf32>, vector<8x48xf32> -> vector<8x48xf32>
    %41 = vector.extract_strided_slice %39 {offsets = [0, 0], sizes = [8, 32], strides = [1, 1]} : vector<8x48xf32> to vector<8x32xf32>
    %42 = vector.extract_strided_slice %40 {offsets = [0, 0], sizes = [8, 32], strides = [1, 1]} : vector<8x48xf32> to vector<8x32xf32>
    %43 = arith.addf %41, %42 : vector<8x32xf32>
    %44 = arith.negf %43 : vector<8x32xf32>
    %45 = math.exp %44 : vector<8x32xf32>
    %cst_19 = arith.constant 1.000000e+00 : f32
    %46 = vector.broadcast %cst_19 : f32 to vector<8x32xf32>
    %47 = arith.addf %46, %45 : vector<8x32xf32>
    %48 = arith.divf %46, %47 : vector<8x32xf32>
    %49 = vector.extract_strided_slice %48 {offsets = [0, 0], sizes = [8, 16], strides = [1, 1]} : vector<8x32xf32> to vector<8x16xf32>
    %50 = vector.extract_strided_slice %48 {offsets = [0, 16], sizes = [8, 16], strides = [1, 1]} : vector<8x32xf32> to vector<8x16xf32>
    %51 = vector.extract_strided_slice %39 {offsets = [0, 32], sizes = [8, 16], strides = [1, 1]} : vector<8x48xf32> to vector<8x16xf32>
    %52 = vector.extract_strided_slice %40 {offsets = [0, 32], sizes = [8, 16], strides = [1, 1]} : vector<8x48xf32> to vector<8x16xf32>
    %53 = arith.addf %52, %5 : vector<8x16xf32>
    %54 = arith.mulf %49, %53 : vector<8x16xf32>
    %55 = arith.addf %51, %54 : vector<8x16xf32>
    %56 = math.tanh %55 : vector<8x16xf32>
    %57 = arith.subf %38, %56 : vector<8x16xf32>
    %58 = arith.mulf %50, %57 : vector<8x16xf32>
    %59 = arith.addf %56, %58 : vector<8x16xf32>
    %60 = vector.extract_strided_slice %16 {offsets = [16, 0], sizes = [8, 48], strides = [1, 1]} : vector<64x48xf32> to vector<8x48xf32>
    %cst_20 = arith.constant dense<0.000000e+00> : vector<8x48xf32>
    %61 = tpu.matmul %59, %2, %cst_20 {dimension_numbers = #tpu.dot_dimension_numbers<[1], [0], [0], [1], [0, 0, 1, 1], [], []>} : vector<8x16xf32>, vector<16x48xf32>, vector<8x48xf32> -> vector<8x48xf32>
    %62 = vector.extract_strided_slice %60 {offsets = [0, 0], sizes = [8, 32], strides = [1, 1]} : vector<8x48xf32> to vector<8x32xf32>
    %63 = vector.extract_strided_slice %61 {offsets = [0, 0], sizes = [8, 32], strides = [1, 1]} : vector<8x48xf32> to vector<8x32xf32>
    %64 = arith.addf %62, %63 : vector<8x32xf32>
    %65 = arith.negf %64 : vector<8x32xf32>
    %66 = math.exp %65 : vector<8x32xf32>
    %cst_21 = arith.constant 1.000000e+00 : f32
    %67 = vector.broadcast %cst_21 : f32 to vector<8x32xf32>
    %68 = arith.addf %67, %66 : vector<8x32xf32>
    %69 = arith.divf %67, %68 : vector<8x32xf32>
    %70 = vector.extract_strided_slice %69 {offsets = [0, 0], sizes = [8, 16], strides = [1, 1]} : vector<8x32xf32> to vector<8x16xf32>
    %71 = vector.extract_strided_slice %69 {offsets = [0, 16], sizes = [8, 16], strides = [1, 1]} : vector<8x32xf32> to vector<8x16xf32>
    %72 = vector.extract_strided_slice %60 {offsets = [0, 32], sizes = [8, 16], strides = [1, 1]} : vector<8x48xf32> to vector<8x16xf32>
    %73 = vector.extract_strided_slice %61 {offsets = [0, 32], sizes = [8, 16], strides = [1, 1]} : vector<8x48xf32> to vector<8x16xf32>
    %74 = arith.addf %73, %5 : vector<8x16xf32>
    %75 = arith.mulf %70, %74 : vector<8x16xf32>
    %76 = arith.addf %72, %75 : vector<8x16xf32>
    %77 = math.tanh %76 : vector<8x16xf32>
    %78 = arith.subf %59, %77 : vector<8x16xf32>
    %79 = arith.mulf %71, %78 : vector<8x16xf32>
    %80 = arith.addf %77, %79 : vector<8x16xf32>
    %81 = vector.extract_strided_slice %16 {offsets = [24, 0], sizes = [8, 48], strides = [1, 1]} : vector<64x48xf32> to vector<8x48xf32>
    %cst_22 = arith.constant dense<0.000000e+00> : vector<8x48xf32>
    %82 = tpu.matmul %80, %2, %cst_22 {dimension_numbers = #tpu.dot_dimension_numbers<[1], [0], [0], [1], [0, 0, 1, 1], [], []>} : vector<8x16xf32>, vector<16x48xf32>, vector<8x48xf32> -> vector<8x48xf32>
    %83 = vector.extract_strided_slice %81 {offsets = [0, 0], sizes = [8, 32], strides = [1, 1]} : vector<8x48xf32> to vector<8x32xf32>
    %84 = vector.extract_strided_slice %82 {offsets = [0, 0], sizes = [8, 32], strides = [1, 1]} : vector<8x48xf32> to vector<8x32xf32>
    %85 = arith.addf %83, %84 : vector<8x32xf32>
    %86 = arith.negf %85 : vector<8x32xf32>
    %87 = math.exp %86 : vector<8x32xf32>
    %cst_23 = arith.constant 1.000000e+00 : f32
    %88 = vector.broadcast %cst_23 : f32 to vector<8x32xf32>
    %89 = arith.addf %88, %87 : vector<8x32xf32>
    %90 = arith.divf %88, %89 : vector<8x32xf32>
    %91 = vector.extract_strided_slice %90 {offsets = [0, 0], sizes = [8, 16], strides = [1, 1]} : vector<8x32xf32> to vector<8x16xf32>
    %92 = vector.extract_strided_slice %90 {offsets = [0, 16], sizes = [8, 16], strides = [1, 1]} : vector<8x32xf32> to vector<8x16xf32>
    %93 = vector.extract_strided_slice %81 {offsets = [0, 32], sizes = [8, 16], strides = [1, 1]} : vector<8x48xf32> to vector<8x16xf32>
    %94 = vector.extract_strided_slice %82 {offsets = [0, 32], sizes = [8, 16], strides = [1, 1]} : vector<8x48xf32> to vector<8x16xf32>
    %95 = arith.addf %94, %5 : vector<8x16xf32>
    %96 = arith.mulf %91, %95 : vector<8x16xf32>
    %97 = arith.addf %93, %96 : vector<8x16xf32>
    %98 = math.tanh %97 : vector<8x16xf32>
    %99 = arith.subf %80, %98 : vector<8x16xf32>
    %100 = arith.mulf %92, %99 : vector<8x16xf32>
    %101 = arith.addf %98, %100 : vector<8x16xf32>
    %102 = vector.extract_strided_slice %16 {offsets = [32, 0], sizes = [8, 48], strides = [1, 1]} : vector<64x48xf32> to vector<8x48xf32>
    %cst_24 = arith.constant dense<0.000000e+00> : vector<8x48xf32>
    %103 = tpu.matmul %101, %2, %cst_24 {dimension_numbers = #tpu.dot_dimension_numbers<[1], [0], [0], [1], [0, 0, 1, 1], [], []>} : vector<8x16xf32>, vector<16x48xf32>, vector<8x48xf32> -> vector<8x48xf32>
    %104 = vector.extract_strided_slice %102 {offsets = [0, 0], sizes = [8, 32], strides = [1, 1]} : vector<8x48xf32> to vector<8x32xf32>
    %105 = vector.extract_strided_slice %103 {offsets = [0, 0], sizes = [8, 32], strides = [1, 1]} : vector<8x48xf32> to vector<8x32xf32>
    %106 = arith.addf %104, %105 : vector<8x32xf32>
    %107 = arith.negf %106 : vector<8x32xf32>
    %108 = math.exp %107 : vector<8x32xf32>
    %cst_25 = arith.constant 1.000000e+00 : f32
    %109 = vector.broadcast %cst_25 : f32 to vector<8x32xf32>
    %110 = arith.addf %109, %108 : vector<8x32xf32>
    %111 = arith.divf %109, %110 : vector<8x32xf32>
    %112 = vector.extract_strided_slice %111 {offsets = [0, 0], sizes = [8, 16], strides = [1, 1]} : vector<8x32xf32> to vector<8x16xf32>
    %113 = vector.extract_strided_slice %111 {offsets = [0, 16], sizes = [8, 16], strides = [1, 1]} : vector<8x32xf32> to vector<8x16xf32>
    %114 = vector.extract_strided_slice %102 {offsets = [0, 32], sizes = [8, 16], strides = [1, 1]} : vector<8x48xf32> to vector<8x16xf32>
    %115 = vector.extract_strided_slice %103 {offsets = [0, 32], sizes = [8, 16], strides = [1, 1]} : vector<8x48xf32> to vector<8x16xf32>
    %116 = arith.addf %115, %5 : vector<8x16xf32>
    %117 = arith.mulf %112, %116 : vector<8x16xf32>
    %118 = arith.addf %114, %117 : vector<8x16xf32>
    %119 = math.tanh %118 : vector<8x16xf32>
    %120 = arith.subf %101, %119 : vector<8x16xf32>
    %121 = arith.mulf %113, %120 : vector<8x16xf32>
    %122 = arith.addf %119, %121 : vector<8x16xf32>
    %123 = vector.extract_strided_slice %16 {offsets = [40, 0], sizes = [8, 48], strides = [1, 1]} : vector<64x48xf32> to vector<8x48xf32>
    %cst_26 = arith.constant dense<0.000000e+00> : vector<8x48xf32>
    %124 = tpu.matmul %122, %2, %cst_26 {dimension_numbers = #tpu.dot_dimension_numbers<[1], [0], [0], [1], [0, 0, 1, 1], [], []>} : vector<8x16xf32>, vector<16x48xf32>, vector<8x48xf32> -> vector<8x48xf32>
    %125 = vector.extract_strided_slice %123 {offsets = [0, 0], sizes = [8, 32], strides = [1, 1]} : vector<8x48xf32> to vector<8x32xf32>
    %126 = vector.extract_strided_slice %124 {offsets = [0, 0], sizes = [8, 32], strides = [1, 1]} : vector<8x48xf32> to vector<8x32xf32>
    %127 = arith.addf %125, %126 : vector<8x32xf32>
    %128 = arith.negf %127 : vector<8x32xf32>
    %129 = math.exp %128 : vector<8x32xf32>
    %cst_27 = arith.constant 1.000000e+00 : f32
    %130 = vector.broadcast %cst_27 : f32 to vector<8x32xf32>
    %131 = arith.addf %130, %129 : vector<8x32xf32>
    %132 = arith.divf %130, %131 : vector<8x32xf32>
    %133 = vector.extract_strided_slice %132 {offsets = [0, 0], sizes = [8, 16], strides = [1, 1]} : vector<8x32xf32> to vector<8x16xf32>
    %134 = vector.extract_strided_slice %132 {offsets = [0, 16], sizes = [8, 16], strides = [1, 1]} : vector<8x32xf32> to vector<8x16xf32>
    %135 = vector.extract_strided_slice %123 {offsets = [0, 32], sizes = [8, 16], strides = [1, 1]} : vector<8x48xf32> to vector<8x16xf32>
    %136 = vector.extract_strided_slice %124 {offsets = [0, 32], sizes = [8, 16], strides = [1, 1]} : vector<8x48xf32> to vector<8x16xf32>
    %137 = arith.addf %136, %5 : vector<8x16xf32>
    %138 = arith.mulf %133, %137 : vector<8x16xf32>
    %139 = arith.addf %135, %138 : vector<8x16xf32>
    %140 = math.tanh %139 : vector<8x16xf32>
    %141 = arith.subf %122, %140 : vector<8x16xf32>
    %142 = arith.mulf %134, %141 : vector<8x16xf32>
    %143 = arith.addf %140, %142 : vector<8x16xf32>
    %144 = vector.extract_strided_slice %16 {offsets = [48, 0], sizes = [8, 48], strides = [1, 1]} : vector<64x48xf32> to vector<8x48xf32>
    %cst_28 = arith.constant dense<0.000000e+00> : vector<8x48xf32>
    %145 = tpu.matmul %143, %2, %cst_28 {dimension_numbers = #tpu.dot_dimension_numbers<[1], [0], [0], [1], [0, 0, 1, 1], [], []>} : vector<8x16xf32>, vector<16x48xf32>, vector<8x48xf32> -> vector<8x48xf32>
    %146 = vector.extract_strided_slice %144 {offsets = [0, 0], sizes = [8, 32], strides = [1, 1]} : vector<8x48xf32> to vector<8x32xf32>
    %147 = vector.extract_strided_slice %145 {offsets = [0, 0], sizes = [8, 32], strides = [1, 1]} : vector<8x48xf32> to vector<8x32xf32>
    %148 = arith.addf %146, %147 : vector<8x32xf32>
    %149 = arith.negf %148 : vector<8x32xf32>
    %150 = math.exp %149 : vector<8x32xf32>
    %cst_29 = arith.constant 1.000000e+00 : f32
    %151 = vector.broadcast %cst_29 : f32 to vector<8x32xf32>
    %152 = arith.addf %151, %150 : vector<8x32xf32>
    %153 = arith.divf %151, %152 : vector<8x32xf32>
    %154 = vector.extract_strided_slice %153 {offsets = [0, 0], sizes = [8, 16], strides = [1, 1]} : vector<8x32xf32> to vector<8x16xf32>
    %155 = vector.extract_strided_slice %153 {offsets = [0, 16], sizes = [8, 16], strides = [1, 1]} : vector<8x32xf32> to vector<8x16xf32>
    %156 = vector.extract_strided_slice %144 {offsets = [0, 32], sizes = [8, 16], strides = [1, 1]} : vector<8x48xf32> to vector<8x16xf32>
    %157 = vector.extract_strided_slice %145 {offsets = [0, 32], sizes = [8, 16], strides = [1, 1]} : vector<8x48xf32> to vector<8x16xf32>
    %158 = arith.addf %157, %5 : vector<8x16xf32>
    %159 = arith.mulf %154, %158 : vector<8x16xf32>
    %160 = arith.addf %156, %159 : vector<8x16xf32>
    %161 = math.tanh %160 : vector<8x16xf32>
    %162 = arith.subf %143, %161 : vector<8x16xf32>
    %163 = arith.mulf %155, %162 : vector<8x16xf32>
    %164 = arith.addf %161, %163 : vector<8x16xf32>
    %165 = vector.extract_strided_slice %16 {offsets = [56, 0], sizes = [8, 48], strides = [1, 1]} : vector<64x48xf32> to vector<8x48xf32>
    %cst_30 = arith.constant dense<0.000000e+00> : vector<8x48xf32>
    %166 = tpu.matmul %164, %2, %cst_30 {dimension_numbers = #tpu.dot_dimension_numbers<[1], [0], [0], [1], [0, 0, 1, 1], [], []>} : vector<8x16xf32>, vector<16x48xf32>, vector<8x48xf32> -> vector<8x48xf32>
    %167 = vector.extract_strided_slice %165 {offsets = [0, 0], sizes = [8, 32], strides = [1, 1]} : vector<8x48xf32> to vector<8x32xf32>
    %168 = vector.extract_strided_slice %166 {offsets = [0, 0], sizes = [8, 32], strides = [1, 1]} : vector<8x48xf32> to vector<8x32xf32>
    %169 = arith.addf %167, %168 : vector<8x32xf32>
    %170 = arith.negf %169 : vector<8x32xf32>
    %171 = math.exp %170 : vector<8x32xf32>
    %cst_31 = arith.constant 1.000000e+00 : f32
    %172 = vector.broadcast %cst_31 : f32 to vector<8x32xf32>
    %173 = arith.addf %172, %171 : vector<8x32xf32>
    %174 = arith.divf %172, %173 : vector<8x32xf32>
    %175 = vector.extract_strided_slice %174 {offsets = [0, 0], sizes = [8, 16], strides = [1, 1]} : vector<8x32xf32> to vector<8x16xf32>
    %176 = vector.extract_strided_slice %174 {offsets = [0, 16], sizes = [8, 16], strides = [1, 1]} : vector<8x32xf32> to vector<8x16xf32>
    %177 = vector.extract_strided_slice %165 {offsets = [0, 32], sizes = [8, 16], strides = [1, 1]} : vector<8x48xf32> to vector<8x16xf32>
    %178 = vector.extract_strided_slice %166 {offsets = [0, 32], sizes = [8, 16], strides = [1, 1]} : vector<8x48xf32> to vector<8x16xf32>
    %179 = arith.addf %178, %5 : vector<8x16xf32>
    %180 = arith.mulf %175, %179 : vector<8x16xf32>
    %181 = arith.addf %177, %180 : vector<8x16xf32>
    %182 = math.tanh %181 : vector<8x16xf32>
    %183 = arith.subf %164, %182 : vector<8x16xf32>
    %184 = arith.mulf %176, %183 : vector<8x16xf32>
    %185 = arith.addf %182, %184 : vector<8x16xf32>
    %c0_32 = arith.constant 0 : index
    %c0_33 = arith.constant 0 : index
    %186 = vector.load %arg7[%c0_32, %c0_33] : memref<16x128xf32, #tpu.memory_space<vmem>>, vector<16x128xf32>
    %cst_34 = arith.constant dense<0.000000e+00> : vector<8x128xf32>
    %187 = tpu.matmul %185, %186, %cst_34 {dimension_numbers = #tpu.dot_dimension_numbers<[1], [0], [0], [1], [0, 0, 1, 1], [], []>} : vector<8x16xf32>, vector<16x128xf32>, vector<8x128xf32> -> vector<8x128xf32>
    %c0_35 = arith.constant 0 : index
    %c0_36 = arith.constant 0 : index
    %188 = vector.load %arg8[%c0_35, %c0_36] : memref<1x128xf32, #tpu.memory_space<vmem>>, vector<1x128xf32>
    %189 = vector.broadcast %188 : vector<1x128xf32> to vector<8x128xf32>
    %190 = arith.addf %187, %189 : vector<8x128xf32>
    %c0_37 = arith.constant 0 : index
    %c0_38 = arith.constant 0 : index
    %191 = vector.load %arg9[%c0_37, %c0_38] : memref<8x128xf32, #tpu.memory_space<vmem>>, vector<8x128xf32>
    tpu.vector_store %arg9[%c0_37, %c0_38], %190 {strides = array<i32>} : memref<8x128xf32, #tpu.memory_space<vmem>>, vector<8x128xf32>,
    return
  }
}

</mosaic_0001>

<bundles_post_ra>
// kernel: _forward_impl.1
= control target key start
LH: loop header
LB: loop body
LE: loop exit
PB: predicated region body
PF: predicated region fallthrough
CT: control target
= control target key end

     0   :  { %vm63_vm0 = vcmask 261120   ;;  %v1572_v11 = vmov 0.0|0.0   ;;  %vm1573_vm1 = vmmov 0   ;;  %v1574_v18 = vmov 0.0   ;;  %s1578_s25 = smov 16   ;;  %s1841_s1 = inlined_call_operand.vmem [shape: f32[32,32], index: 1, kind: input, shape index: {}]   ;;  %s1842_s0 = inlined_call_operand.vmem [shape: f32[8,8,32], index: 0, kind: input, shape index: {}]   ;;  %s1843_s5 = inlined_call_operand.vmem [shape: f32[16,48], index: 5, kind: input, shape index: {}]   ;;  %s1844_s3 = inlined_call_operand.vmem [shape: f32[32,48], index: 3, kind: input, shape index: {}]   ;;  %s1845_s6 = inlined_call_operand.vmem [shape: f32[1,16], index: 6, kind: input, shape index: {}]   ;;  %s1846_s2 = inlined_call_operand.vmem [shape: f32[1,32], index: 2, kind: input, shape index: {}]   ;;  %s1847_s4 = inlined_call_operand.vmem [shape: f32[1,48], index: 4, kind: input, shape index: {}]   ;;  %s1848_s7 = inlined_call_operand.vmem [shape: f32[16,128], index: 7, kind: input, shape index: {}]   ;;  %s1849_s8 = inlined_call_operand.vmem [shape: f32[1,128], index: 8, kind: input, shape index: {}]   ;;  %s1850_s9 = inlined_call_operand.vmem [shape: f32[8,128], index: 9, kind: output, shape index: {}]  }
   0x1   :  { %v32_v0 = vld [vmem:[%s1841_s1] sm:$0xff]  ;;  %v33_v1 = vld [vmem:[%s1841_s1 + $0x8] sm:$0xff]  ;;  %v34_v2 = vld [vmem:[%s1841_s1 + $0x10] sm:$0xff]  ;;  %vm337_vm2 = vcmask 130048  }
   0x2   :  { %v1458_v3 = vpack.c.bf16 %v33_v1, %v32_v0  ;;  %v35_v4 = vld [vmem:[%s1841_s1 + $0x18] sm:$0xff]  ;;  %v48_v5 = vld [vmem:[%s1842_s0] sm:$0xff]  ;;  %v41_v8 = vld [vmem:[%s1843_s5 + $0x8] sm:$0xff]  ;;  %s1575_s1 = smov 32  }
   0x3   :  { %v1462_v6 = vpack.c.bf16 %v35_v4, %v34_v2  ;;  %1363 = vmatprep.mubr.msk.f32.mxu0 %vm63_vm0, %v48_v5  ;;  %v40_v7 = vld [vmem:[%s1843_s5] sm:$0xff]  ;;  %v49_v9 = vld [vmem:[%s1842_s0 + $0x8] sm:$0xff]  ;;  %v50_v12 = vld [vmem:[%s1842_s0 + $0x10] sm:$0xff] }
   0x4   :  { %1459 = vmatprep.subr.bf16.mxu0 %v1458_v3  ;;  %v1654_v10 = vpack.c.bf16 %v41_v8, %v40_v7  ;;  %v51_v13 = vld [vmem:[%s1842_s0 + $0x18] sm:$0xff]  ;;  %v52_v14 = vld [vmem:[%s1842_s0 + $0x20] sm:$0xff]  ;;  %v53_v15 = vld [vmem:[%s1842_s0 + $0x28] sm:$0xff] }
   0x5   :  { %1461 = vmatpush3.bf16.msra.mxu0 %v1458_v3  ;;  %v54_v16 = vld [vmem:[%s1842_s0 + $0x30] sm:$0xff]  ;;  %v55_v17 = vld [vmem:[%s1842_s0 + $0x38] sm:$0xff]  ;;  %v36_v19 = vld [vmem:[%s1844_s3] sm:$0xff] }
   0x6   :  { %1463 = vmatprep.subr.bf16.mxu0 %v1462_v6  ;;  %v37_v20 = vld [vmem:[%s1844_s3 + $0x8] sm:$0xff]  ;;  %v38_v21 = vld [vmem:[%s1844_s3 + $0x10] sm:$0xff]  ;;  %v39_v23 = vld [vmem:[%s1844_s3 + $0x18] sm:$0xff] }
   0x7   :  { %v1466_v22 = vpack.c.bf16 %v37_v20, %v36_v19  ;;  %v1470_v24 = vpack.c.bf16 %v39_v23, %v38_v21  ;;  %v1268_v25 = vld [vmem:[%s1845_s6] ss:$0 sm:$0xff] }
   0x8   :  { %418 = vrot.lane.b32.xlu0 %v1268_v25, %s1575_s1  ;;  %v1269_v26 = vld [vmem:[%s1846_s2] ss:$0 sm:$0xff]  ;;  %s1576_s2 = smov 96  }
   0x9   :  { %1465 = vmatpush3.bf16.msra.mxu0 %v1462_v6  ;;  %1467 = vmatprep.subr.bf16.mxu1 %v1466_v22  ;;  %v1278_v55 = vld [vmem:[%s1847_s4] ss:$0 sm:$0xff]  ;;  %s1577_s4 = smov 112  }
   0xa   :  { %1474 = vmatprep.subr.bf16.mxu0 %v1572_v11  ;;  %1469 = vmatpush3.bf16.msra.mxu1 %v1466_v22 }
   0xb   :  { %1471 = vmatprep.subr.bf16.mxu1 %v1470_v24 }
   0xc   :  { %1364 = vmatmul.mubr.msk.f32.vlgmr.msra.gmra.mrb[0].mxu0 %vm63_vm0, %v49_v9 }
   0xd   :  { %1366 = vmatprep.mubr.msk.f32.mxu0 %vm63_vm0, %v50_v12  ;;  %1476 = vmatpush3.bf16.msra.mxu0 %v1654_v10 }
   0xe   :  { %1480 = vmatprep.subr.bf16.mxu0 %v1572_v11  ;;  %1473 = vmatpush3.bf16.msra.mxu1 %v1470_v24 }
   0xf   :  { %1477 = vmatprep.subr.bf16.mxu1 %v1572_v11 }
  0x10   :  { %1367 = vmatmul.mubr.msk.f32.gmra.mrb[2].mxu0 %vm63_vm0, %v51_v13 }
  0x11   :  { %1369 = vmatprep.mubr.msk.f32.mxu0 %vm63_vm0, %v52_v14 }
  0x14   :  { %1370 = vmatmul.mubr.msk.f32.gmra.mrb[4].mxu0 %vm63_vm0, %v53_v15 }
  0x15   :  { %1372 = vmatprep.mubr.msk.f32.mxu0 %vm63_vm0, %v54_v16 }
  0x18   :  { %1373 = vmatmul.mubr.msk.f32.gmra.mrb[6].mxu0 %vm63_vm0, %v55_v17 }
  0x19   :  { %1399 = vmatprep.mubr.msk.f32.mxu0 %vm1573_vm1, %v1574_v18 }
  0x1c   :  { %1400 = vmatmul.mubr.f32.vlgmr.msra.gmra.mrb[8].mxu0 %v1574_v18 }
  0x1d   :  { %1482 = vmatpush3.bf16.msra.mxu0 %v1654_v10  ;;  %1413 = vmatprep.mubr.msk.f32.mxu0 %vm1573_vm1, %v1574_v18 }
  0x1e   :  { %1486 = vmatprep.subr.bf16.mxu0 %v1572_v11 }
  0x7a   :  { %v1711_v44 = vpop.permute.xlu0 %418 }
  0xdf   :  { %v1365_v27 = vpop.f32.mrb[0].mxu0 }
  0xe0   :  { %v160_v28 = vadd.f32 %v1365_v27, %v1269_v26  ;;  %v154_v29 = vpop.f32.mrb[1].mxu0 }
  0xe1   :  { %v155_v30 = vadd.f32 %v1269_v26, %v154_v29 }
  0xe3   :  { %1508 = vtanh.f32 %v155_v30  ;;  %v1368_v31 = vpop.f32.mrb[2].mxu0 }
  0xe4   :  { %1510 = vtanh.f32 %v160_v28  ;;  %v170_v32 = vadd.f32 %v1368_v31, %v1269_v26  ;;  %v164_v33 = vpop.f32.mrb[3].mxu0 }
  0xe5   :  { %v165_v34 = vadd.f32 %v1269_v26, %v164_v33 }
  0xe6   :  { %1512 = vtanh.f32 %v170_v32 }
  0xe7   :  { %1514 = vtanh.f32 %v165_v34  ;;  %v1371_v35 = vpop.f32.mrb[4].mxu0 }
  0xe8   :  { %v180_v36 = vadd.f32 %v1371_v35, %v1269_v26  ;;  %v174_v37 = vpop.f32.mrb[5].mxu0 }
  0xe9   :  { %v175_v38 = vadd.f32 %v1269_v26, %v174_v37 }
  0xea   :  { %1516 = vtanh.f32 %v180_v36 }
  0xeb   :  { %1518 = vtanh.f32 %v175_v38  ;;  %v1374_v39 = vpop.f32.mrb[6].mxu0 }
  0xec   :  { %v190_v40 = vadd.f32 %v1374_v39, %v1269_v26  ;;  %v184_v41 = vpop.f32.mrb[7].mxu0 }
  0xed   :  { %v1509_v42 = vpop.eup %1508  ;;  %v185_v43 = vadd.f32 %v1269_v26, %v184_v41 }
  0xee   :  { %v1511_v45 = vpop.eup %1510  ;;  %1383 = vmatprep.mubr.msk.f32.mxu1 %vm63_vm0, %v1509_v42  ;;  %1520 = vtanh.f32 %v190_v40 }
  0xef   :  { %1384 = vmatmul.mubr.msk.f32.vlgmr.msra.gmra.mrb[0].mxu1 %vm63_vm0, %v1511_v45  ;;  %1522 = vtanh.f32 %v185_v43  ;;  %v407_v46 = vpop.f32.mrb[8].mxu0 }
  0xf0   :  { %v1513_v47 = vpop.eup %1512  ;;  %v1401_v48 = vpop.f32.mrb[9].mxu0  ;;  %v421_v49 = vadd.f32 %v1711_v44, %v407_v46  ;;  %1479 = vmatpush3.bf16.msra.mxu1 %v1654_v10 }
  0xf1   :  { %v1515_v50 = vpop.eup %1514  ;;  %1483 = vmatprep.subr.bf16.mxu1 %v1572_v11 }
  0xf2   :  { %1386 = vmatprep.mubr.msk.f32.mxu1 %vm63_vm0, %v1515_v50  ;;  %423 = vrot.lane.b32.xlu0 %v421_v49, %s1576_s2 }
  0xf3   :  { %1387 = vmatmul.mubr.msk.f32.gmra.mrb[2].mxu1 %vm63_vm0, %v1513_v47 }
  0xf4   :  { %v1517_v51 = vpop.eup %1516 }
  0xf5   :  { %v1519_v52 = vpop.eup %1518 }
  0xf6   :  { %1389 = vmatprep.mubr.msk.f32.mxu1 %vm63_vm0, %v1519_v52 }
  0xf7   :  { %1390 = vmatmul.mubr.msk.f32.gmra.mrb[4].mxu1 %vm63_vm0, %v1517_v51 }
  0xf8   :  { %v1521_v53 = vpop.eup %1520 }
  0xf9   :  { %v1523_v54 = vpop.eup %1522 }
  0xfa   :  { %1392 = vmatprep.mubr.msk.f32.mxu1 %vm63_vm0, %v1523_v54 }
  0xfb   :  { %1393 = vmatmul.mubr.msk.f32.gmra.mrb[6].mxu1 %vm63_vm0, %v1521_v53 }
  0xfc   :  { %1406 = vmatprep.mubr.msk.f32.mxu1 %vm1573_vm1, %v1574_v18 }
 0x164   :  { %v424_v14 = vpop.permute.xlu0 %423 }
 0x1c2   :  { %v1385_v56 = vpop.f32.mrb[0].mxu1 }
 0x1c3   :  { %v304_v57 = vadd.f32 %v1385_v56, %v1278_v55  ;;  %v298_v58 = vpop.f32.mrb[1].mxu1 }
 0x1c4   :  { %v299_v59 = vadd.f32 %v1278_v55, %v298_v58 }
 0x1c6   :  { %v411_v60 = vadd.f32 %v407_v46, %v299_v59  ;;  %v1388_v61 = vpop.f32.mrb[2].mxu1 }
 0x1c7   :  { %v1730_v62 = vadd.f32 %v1388_v61, %v1278_v55  ;;  %v308_v63 = vpop.f32.mrb[3].mxu1 }
 0x1c8   :  { %v1287_v0 = vmul.f32 -1.442695, %v411_v60  ;;  %v1732_v1 = vadd.f32 %v1278_v55, %v308_v63 }
 0x1ca   :  { %1524 = vpow2.f32 %v1287_v0  ;;  %v1391_v2 = vpop.f32.mrb[4].mxu1 }
 0x1cb   :  { %v1734_v3 = vadd.f32 %v1391_v2, %v1278_v55  ;;  %v318_v4 = vpop.f32.mrb[5].mxu1 }
 0x1cc   :  { %v1736_v5 = vadd.f32 %v1278_v55, %v318_v4 }
 0x1ce   :  { %v1394_v6 = vpop.f32.mrb[6].mxu1 }
 0x1cf   :  { %v1738_v7 = vadd.f32 %v1394_v6, %v1278_v55  ;;  %v328_v8 = vpop.f32.mrb[7].mxu1 }
 0x1d0   :  { %v1740_v9 = vadd.f32 %v1278_v55, %v328_v8 }
 0x1d4   :  { %v1525_v12 = vpop.eup %1524 }
 0x1d5   :  { %v415_v13 = vadd.f32 1.0, %v1525_v12 }
 0x1d7   :  { %1526 = vrcp.f32 %v415_v13 }
 0x1e1   :  { %v1527_v15 = vpop.eup %1526 }
 0x1e2   :  { %v426_v16 = vmul.f32 %v1527_v15, %v424_v14 }
 0x1e4   :  { %428 = vrot.lane.b32.xlu1 %v426_v16, %s1575_s1 }
 0x256   :  { %v429_v17 = vpop.permute.xlu1 %428 }
 0x257   :  { %v431_v19 = vadd.f32 %v429_v17, %v299_v59 }
 0x259   :  { %1528 = vtanh.f32 %v431_v19 }
 0x263   :  { %v1529_v20 = vpop.eup %1528 }
 0x264   :  { %v433_v21 = vsub.f32 0.0, %v1529_v20 }
 0x266   :  { %435 = vrot.lane.b32.xlu1 %v433_v21, %s1577_s4 }
 0x2d8   :  { %v436_v22 = vpop.permute.xlu1 %435 }
 0x2d9   :  { %v438_v23 = vmul.f32 %v1527_v15, %v436_v22 }
 0x2db   :  { %440 = vrot.lane.b32.xlu0 %v438_v23, %s1578_s25 }
 0x34d   :  { %v441_v24 = vpop.permute.xlu0 %440 }
 0x34e   :  { %v443_v25 = vadd.f32 %v1529_v20, %v441_v24 }
 0x350   :  { %445 = vrot.lane.b32.xlu1 %v443_v25, %s1576_s2 }
 0x3c2   :  { %v446_v26 = vpop.permute.xlu1 %445 }
 0x3c3   :  { %1407 = vmatmul.mubr.msk.f32.vlgmr.msra.gmra.mrb[8].mxu1 %vm337_vm2, %v446_v26 }
 0x3c4   :  { %1485 = vmatpush3.bf16.msra.mxu1 %v1654_v10  ;;  %1420 = vmatprep.mubr.msk.f32.mxu1 %vm1573_vm1, %v1574_v18 }
 0x3c5   :  { %1489 = vmatprep.subr.bf16.mxu1 %v1572_v11 }
 0x496   :  { %v515_v27 = vpop.f32.mrb[8].mxu1 }
 0x497   :  { %v526_v28 = vadd.f32 %v515_v27, %v1711_v44  ;;  %v1408_v29 = vpop.f32.mrb[9].mxu1  ;;  %v519_v30 = vadd.f32 %v515_v27, %v304_v57 }
 0x499   :  { %528 = vrot.lane.b32.xlu0 %v526_v28, %s1576_s2  ;;  %v1289_v31 = vmul.f32 -1.442695, %v519_v30 }
 0x49b   :  { %1530 = vpow2.f32 %v1289_v31 }
 0x4a5   :  { %v1531_v32 = vpop.eup %1530 }
 0x4a6   :  { %v523_v33 = vadd.f32 1.0, %v1531_v32 }
 0x4a8   :  { %1532 = vrcp.f32 %v523_v33 }
 0x4b2   :  { %v1533_v34 = vpop.eup %1532 }
 0x50b   :  { %v529_v35 = vpop.permute.xlu0 %528 }
 0x50c   :  { %v531_v36 = vmul.f32 %v1533_v34, %v529_v35 }
 0x50e   :  { %533 = vrot.lane.b32.xlu1 %v531_v36, %s1575_s1 }
 0x580   :  { %v534_v37 = vpop.permute.xlu1 %533 }
 0x581   :  { %v536_v38 = vadd.f32 %v534_v37, %v304_v57 }
 0x583   :  { %1534 = vtanh.f32 %v536_v38 }
 0x58d   :  { %v1535_v39 = vpop.eup %1534 }
 0x58e   :  { %v538_v40 = vsub.f32 %v443_v25, %v1535_v39 }
 0x590   :  { %540 = vrot.lane.b32.xlu0 %v538_v40, %s1577_s4 }
 0x602   :  { %v541_v41 = vpop.permute.xlu0 %540 }
 0x603   :  { %v543_v42 = vmul.f32 %v1533_v34, %v541_v41 }
 0x605   :  { %545 = vrot.lane.b32.xlu1 %v543_v42, %s1578_s25 }
 0x677   :  { %v546_v43 = vpop.permute.xlu1 %545 }
 0x678   :  { %v548_v45 = vadd.f32 %v1535_v39, %v546_v43 }
 0x67a   :  { %550 = vrot.lane.b32.xlu0 %v548_v45, %s1576_s2 }
 0x6ec   :  { %v551_v46 = vpop.permute.xlu0 %550 }
 0x6ed   :  { %1414 = vmatmul.mubr.msk.f32.vlgmr.msra.gmra.mrb[10].mxu0 %vm337_vm2, %v551_v46 }
 0x6ee   :  { %1488 = vmatpush3.bf16.msra.mxu0 %v1654_v10  ;;  %1427 = vmatprep.mubr.msk.f32.mxu0 %vm1573_vm1, %v1574_v18 }
 0x6ef   :  { %1492 = vmatprep.subr.bf16.mxu0 %v1572_v11 }
 0x7c0   :  { %v620_v47 = vpop.f32.mrb[10].mxu0 }
 0x7c1   :  { %v631_v48 = vadd.f32 %v620_v47, %v1711_v44  ;;  %v1415_v49 = vpop.f32.mrb[11].mxu0  ;;  %v624_v50 = vadd.f32 %v620_v47, %v1732_v1 }
 0x7c3   :  { %633 = vrot.lane.b32.xlu1 %v631_v48, %s1576_s2  ;;  %v1291_v51 = vmul.f32 -1.442695, %v624_v50 }
 0x7c5   :  { %1536 = vpow2.f32 %v1291_v51 }
 0x7cf   :  { %v1537_v52 = vpop.eup %1536 }
 0x7d0   :  { %v628_v53 = vadd.f32 1.0, %v1537_v52 }
 0x7d2   :  { %1538 = vrcp.f32 %v628_v53 }
 0x7dc   :  { %v1539_v54 = vpop.eup %1538 }
 0x835   :  { %v634_v55 = vpop.permute.xlu1 %633 }
 0x836   :  { %v636_v56 = vmul.f32 %v1539_v54, %v634_v55 }
 0x838   :  { %638 = vrot.lane.b32.xlu0 %v636_v56, %s1575_s1 }
 0x8aa   :  { %v639_v57 = vpop.permute.xlu0 %638 }
 0x8ab   :  { %v641_v58 = vadd.f32 %v639_v57, %v1732_v1 }
 0x8ad   :  { %1540 = vtanh.f32 %v641_v58 }
 0x8b7   :  { %v1541_v59 = vpop.eup %1540 }
 0x8b8   :  { %v643_v60 = vsub.f32 %v548_v45, %v1541_v59 }
 0x8ba   :  { %645 = vrot.lane.b32.xlu1 %v643_v60, %s1577_s4 }
 0x92c   :  { %v646_v61 = vpop.permute.xlu1 %645 }
 0x92d   :  { %v648_v63 = vmul.f32 %v1539_v54, %v646_v61 }
 0x92f   :  { %650 = vrot.lane.b32.xlu0 %v648_v63, %s1578_s25 }
 0x9a1   :  { %v651_v0 = vpop.permute.xlu0 %650 }
 0x9a2   :  { %v653_v2 = vadd.f32 %v1541_v59, %v651_v0 }
 0x9a4   :  { %655 = vrot.lane.b32.xlu1 %v653_v2, %s1576_s2 }
 0xa16   :  { %v656_v4 = vpop.permute.xlu1 %655 }
 0xa17   :  { %1421 = vmatmul.mubr.msk.f32.vlgmr.msra.gmra.mrb[10].mxu1 %vm337_vm2, %v656_v4 }
 0xa18   :  { %1491 = vmatpush3.bf16.msra.mxu1 %v1654_v10  ;;  %1434 = vmatprep.mubr.msk.f32.mxu1 %vm1573_vm1, %v1574_v18 }
 0xa19   :  { %1495 = vmatprep.subr.bf16.mxu1 %v1572_v11 }
 0xaea   :  { %v725_v1 = vpop.f32.mrb[10].mxu1 }
 0xaeb   :  { %v736_v6 = vadd.f32 %v725_v1, %v1711_v44  ;;  %v1422_v8 = vpop.f32.mrb[11].mxu1  ;;  %v729_v12 = vadd.f32 %v725_v1, %v1730_v62 }
 0xaed   :  { %738 = vrot.lane.b32.xlu0 %v736_v6, %s1576_s2  ;;  %v1293_v13 = vmul.f32 -1.442695, %v729_v12 }
 0xaef   :  { %1542 = vpow2.f32 %v1293_v13 }
 0xaf9   :  { %v1543_v14 = vpop.eup %1542 }
 0xafa   :  { %v733_v15 = vadd.f32 1.0, %v1543_v14 }
 0xafc   :  { %1544 = vrcp.f32 %v733_v15 }
 0xb06   :  { %v1545_v16 = vpop.eup %1544 }
 0xb5f   :  { %v739_v17 = vpop.permute.xlu0 %738 }
 0xb60   :  { %v741_v19 = vmul.f32 %v1545_v16, %v739_v17 }
 0xb62   :  { %743 = vrot.lane.b32.xlu1 %v741_v19, %s1575_s1 }
 0xbd4   :  { %v744_v20 = vpop.permute.xlu1 %743 }
 0xbd5   :  { %v746_v21 = vadd.f32 %v744_v20, %v1730_v62 }
 0xbd7   :  { %1546 = vtanh.f32 %v746_v21 }
 0xbe1   :  { %v1547_v22 = vpop.eup %1546 }
 0xbe2   :  { %v748_v23 = vsub.f32 %v653_v2, %v1547_v22 }
 0xbe4   :  { %750 = vrot.lane.b32.xlu0 %v748_v23, %s1577_s4 }
 0xc56   :  { %v751_v24 = vpop.permute.xlu0 %750 }
 0xc57   :  { %v753_v25 = vmul.f32 %v1545_v16, %v751_v24 }
 0xc59   :  { %755 = vrot.lane.b32.xlu1 %v753_v25, %s1578_s25 }
 0xccb   :  { %v756_v26 = vpop.permute.xlu1 %755 }
 0xccc   :  { %v758_v27 = vadd.f32 %v1547_v22, %v756_v26 }
 0xcce   :  { %760 = vrot.lane.b32.xlu0 %v758_v27, %s1576_s2 }
 0xd40   :  { %v761_v28 = vpop.permute.xlu0 %760 }
 0xd41   :  { %1428 = vmatmul.mubr.msk.f32.vlgmr.msra.gmra.mrb[12].mxu0 %vm337_vm2, %v761_v28 }
 0xd42   :  { %1494 = vmatpush3.bf16.msra.mxu0 %v1654_v10  ;;  %1441 = vmatprep.mubr.msk.f32.mxu0 %vm1573_vm1, %v1574_v18 }
 0xd43   :  { %1498 = vmatprep.subr.bf16.mxu0 %v1572_v11 }
 0xe14   :  { %v830_v62 = vpop.f32.mrb[12].mxu0 }
 0xe15   :  { %v841_v29 = vadd.f32 %v830_v62, %v1711_v44  ;;  %v1429_v30 = vpop.f32.mrb[13].mxu0  ;;  %v834_v31 = vadd.f32 %v830_v62, %v1736_v5 }
 0xe17   :  { %843 = vrot.lane.b32.xlu1 %v841_v29, %s1576_s2  ;;  %v1295_v32 = vmul.f32 -1.442695, %v834_v31 }
 0xe19   :  { %1548 = vpow2.f32 %v1295_v32 }
 0xe23   :  { %v1549_v33 = vpop.eup %1548 }
 0xe24   :  { %v838_v34 = vadd.f32 1.0, %v1549_v33 }
 0xe26   :  { %1550 = vrcp.f32 %v838_v34 }
 0xe30   :  { %v1551_v35 = vpop.eup %1550 }
 0xe89   :  { %v844_v36 = vpop.permute.xlu1 %843 }
 0xe8a   :  { %v846_v37 = vmul.f32 %v1551_v35, %v844_v36  ;;  %v1179_v36 = vld [vmem:[%s1848_s7] sm:$0xff] }
 0xe8c   :  { %848 = vrot.lane.b32.xlu0 %v846_v37, %s1575_s1  ;;  %v1180_v37 = vld [vmem:[%s1848_s7 + $0x8] sm:$0xff] }
 0xefe   :  { %v849_v38 = vpop.permute.xlu0 %848 }
 0xeff   :  { %v851_v11 = vadd.f32 %v849_v38, %v1736_v5  ;;  %v1499_v38 = vpack.c.bf16 %v1180_v37, %v1179_v36 }
 0xf01   :  { %1552 = vtanh.f32 %v851_v11 }
 0xf0b   :  { %v1553_v39 = vpop.eup %1552 }
 0xf0c   :  { %v853_v40 = vsub.f32 %v758_v27, %v1553_v39 }
 0xf0e   :  { %855 = vrot.lane.b32.xlu1 %v853_v40, %s1577_s4 }
 0xf80   :  { %v856_v41 = vpop.permute.xlu1 %855 }
 0xf81   :  { %v858_v42 = vmul.f32 %v1551_v35, %v856_v41 }
 0xf83   :  { %860 = vrot.lane.b32.xlu0 %v858_v42, %s1578_s25  ;;  %v1302_v42 = vld [vmem:[%s1849_s8] ss:$0 sm:$0xff] }
 0xff5   :  { %v861_v43 = vpop.permute.xlu0 %860 }
 0xff6   :  { %v863_v45 = vadd.f32 %v1553_v39, %v861_v43 }
 0xff8   :  { %865 = vrot.lane.b32.xlu1 %v863_v45, %s1576_s2 }
0x106a   :  { %v866_v46 = vpop.permute.xlu1 %865 }
0x106b   :  { %1435 = vmatmul.mubr.msk.f32.vlgmr.msra.gmra.mrb[12].mxu1 %vm337_vm2, %v866_v46 }
0x106c   :  { %1497 = vmatpush3.bf16.msra.mxu1 %v1654_v10  ;;  %1448 = vmatprep.mubr.msk.f32.mxu1 %vm1573_vm1, %v1574_v18 }
0x113e   :  { %v935_v5 = vpop.f32.mrb[12].mxu1 }
0x113f   :  { %v946_v47 = vadd.f32 %v935_v5, %v1711_v44  ;;  %v1436_v48 = vpop.f32.mrb[13].mxu1  ;;  %v939_v49 = vadd.f32 %v935_v5, %v1734_v3 }
0x1141   :  { %948 = vrot.lane.b32.xlu0 %v946_v47, %s1576_s2  ;;  %v1297_v50 = vmul.f32 -1.442695, %v939_v49 }
0x1143   :  { %1554 = vpow2.f32 %v1297_v50 }
0x114d   :  { %v1555_v51 = vpop.eup %1554 }
0x114e   :  { %v943_v52 = vadd.f32 1.0, %v1555_v51 }
0x1150   :  { %1556 = vrcp.f32 %v943_v52 }
0x115a   :  { %v1557_v53 = vpop.eup %1556 }
0x11b3   :  { %v949_v54 = vpop.permute.xlu0 %948 }
0x11b4   :  { %v951_v55 = vmul.f32 %v1557_v53, %v949_v54 }
0x11b6   :  { %953 = vrot.lane.b32.xlu1 %v951_v55, %s1575_s1 }
0x1228   :  { %v954_v10 = vpop.permute.xlu1 %953 }
0x1229   :  { %v956_v56 = vadd.f32 %v954_v10, %v1734_v3 }
0x122b   :  { %1558 = vtanh.f32 %v956_v56 }
0x1235   :  { %v1559_v57 = vpop.eup %1558 }
0x1236   :  { %v958_v58 = vsub.f32 %v863_v45, %v1559_v57 }
0x1238   :  { %960 = vrot.lane.b32.xlu0 %v958_v58, %s1577_s4 }
0x12aa   :  { %v961_v59 = vpop.permute.xlu0 %960 }
0x12ab   :  { %v963_v60 = vmul.f32 %v1557_v53, %v961_v59 }
0x12ad   :  { %965 = vrot.lane.b32.xlu1 %v963_v60, %s1578_s25 }
0x131f   :  { %v966_v61 = vpop.permute.xlu1 %965 }
0x1320   :  { %v968_v63 = vadd.f32 %v1559_v57, %v966_v61 }
0x1322   :  { %970 = vrot.lane.b32.xlu0 %v968_v63, %s1576_s2 }
0x1394   :  { %v971_v0 = vpop.permute.xlu0 %970 }
0x1395   :  { %1442 = vmatmul.mubr.msk.f32.vlgmr.msra.gmra.mrb[14].mxu0 %vm337_vm2, %v971_v0 }
0x1396   :  { %1455 = vmatprep.mubr.msk.f32.mxu0 %vm1573_vm1, %v1574_v18  ;;  %1500 = vmatpush3.bf16.msra.mxu0 %v1499_v38 }
0x1468   :  { %v1040_v3 = vpop.f32.mrb[14].mxu0 }
0x1469   :  { %v1051_v2 = vadd.f32 %v1040_v3, %v1711_v44  ;;  %v1443_v4 = vpop.f32.mrb[15].mxu0  ;;  %v1044_v1 = vadd.f32 %v1040_v3, %v1740_v9 }
0x146b   :  { %1053 = vrot.lane.b32.xlu1 %v1051_v2, %s1576_s2  ;;  %v1299_v6 = vmul.f32 -1.442695, %v1044_v1 }
0x146d   :  { %1560 = vpow2.f32 %v1299_v6 }
0x1477   :  { %v1561_v8 = vpop.eup %1560 }
0x1478   :  { %v1048_v12 = vadd.f32 1.0, %v1561_v8 }
0x147a   :  { %1562 = vrcp.f32 %v1048_v12 }
0x1484   :  { %v1563_v13 = vpop.eup %1562 }
0x14dd   :  { %v1054_v14 = vpop.permute.xlu1 %1053 }
0x14de   :  { %v1056_v15 = vmul.f32 %v1563_v13, %v1054_v14 }
0x14e0   :  { %1058 = vrot.lane.b32.xlu0 %v1056_v15, %s1575_s1 }
0x1552   :  { %v1059_v16 = vpop.permute.xlu0 %1058 }
0x1553   :  { %v1061_v18 = vadd.f32 %v1059_v16, %v1740_v9 }
0x1555   :  { %1564 = vtanh.f32 %v1061_v18 }
0x155f   :  { %v1565_v17 = vpop.eup %1564 }
0x1560   :  { %v1063_v19 = vsub.f32 %v968_v63, %v1565_v17 }
0x1562   :  { %1065 = vrot.lane.b32.xlu1 %v1063_v19, %s1577_s4 }
0x15d4   :  { %v1066_v20 = vpop.permute.xlu1 %1065 }
0x15d5   :  { %v1068_v21 = vmul.f32 %v1563_v13, %v1066_v20 }
0x15d7   :  { %1070 = vrot.lane.b32.xlu0 %v1068_v21, %s1578_s25 }
0x1649   :  { %v1071_v22 = vpop.permute.xlu0 %1070 }
0x164a   :  { %v1073_v23 = vadd.f32 %v1565_v17, %v1071_v22 }
0x164c   :  { %1075 = vrot.lane.b32.xlu1 %v1073_v23, %s1576_s2 }
0x16be   :  { %v1076_v24 = vpop.permute.xlu1 %1075 }
0x16bf   :  { %1449 = vmatmul.mubr.msk.f32.vlgmr.msra.gmra.mrb[14].mxu1 %vm337_vm2, %v1076_v24 }
0x1792   :  { %v1145_v25 = vpop.f32.mrb[14].mxu1 }
0x1793   :  { %v1156_v26 = vadd.f32 %v1145_v25, %v1711_v44  ;;  %v1450_v9 = vpop.f32.mrb[15].mxu1  ;;  %v1149_v27 = vadd.f32 %v1145_v25, %v1738_v7 }
0x1795   :  { %1158 = vrot.lane.b32.xlu0 %v1156_v26, %s1576_s2  ;;  %v1301_v28 = vmul.f32 -1.442695, %v1149_v27 }
0x1797   :  { %1566 = vpow2.f32 %v1301_v28 }
0x17a1   :  { %v1567_v62 = vpop.eup %1566 }
0x17a2   :  { %v1153_v29 = vadd.f32 1.0, %v1567_v62 }
0x17a4   :  { %1568 = vrcp.f32 %v1153_v29 }
0x17ae   :  { %v1569_v30 = vpop.eup %1568 }
0x1807   :  { %v1159_v31 = vpop.permute.xlu0 %1158 }
0x1808   :  { %v1161_v32 = vmul.f32 %v1569_v30, %v1159_v31 }
0x180a   :  { %1163 = vrot.lane.b32.xlu1 %v1161_v32, %s1575_s1 }
0x187c   :  { %v1164_v33 = vpop.permute.xlu1 %1163 }
0x187d   :  { %v1166_v34 = vadd.f32 %v1164_v33, %v1738_v7 }
0x187f   :  { %1570 = vtanh.f32 %v1166_v34 }
0x1889   :  { %v1571_v44 = vpop.eup %1570 }
0x188a   :  { %v1168_v35 = vsub.f32 %v1073_v23, %v1571_v44 }
0x188c   :  { %1170 = vrot.lane.b32.xlu0 %v1168_v35, %s1577_s4 }
0x18fe   :  { %v1171_v11 = vpop.permute.xlu0 %1170 }
0x18ff   :  { %v1173_v39 = vmul.f32 %v1569_v30, %v1171_v11 }
0x1901   :  { %1175 = vrot.lane.b32.xlu1 %v1173_v39, %s1578_s25 }
0x1973   :  { %v1176_v7 = vpop.permute.xlu1 %1175 }
0x1974   :  { %v1178_v40 = vadd.f32 %v1571_v44, %v1176_v7 }
0x1976   :  { %1189 = vrot.lane.b32.xlu0 %v1178_v40, %s1576_s2 }
0x19e8   :  { %v1190_v41 = vpop.permute.xlu0 %1189 }
0x19e9   :  { %1456 = vmatmul.mubr.msk.f32.vlgmr.msra.gmra.mrb[16].mxu0 %vm337_vm2, %v1190_v41 }
0x1abc   :  { %v1259_v43 = vpop.f32.mrb[16].mxu0 }
0x1abd   :  { %v1260_v45 = vadd.f32 %v1302_v42, %v1259_v43  ;;  %v1457_v46 = vpop.f32.mrb[17].mxu0 }
0x1abf   :  { %1263 = vst [vmem:[%s1850_s9] sm:$0xff] %v1260_v45 }

</bundles_post_ra>
